<compile_context>
chip_gen: v5e
topology: v5e:2x2
jax: 0.10.0
libtpu: 0.0.40
codegen_flags: <defaults>
</compile_context>

<pallas_src>
import functools

import jax
import jax.numpy as jnp
from jax.experimental import pallas as pl
from jax.experimental.pallas import tpu as pltpu


def _gcn_kernel(adj_ref, xwb_ref, gamma_ref, beta_ref, out_ref, *,
                use_bn: bool, eps: float, batch: int, out_dim: int):
    """One grid step = one tile of destination atoms (all batches, all features)."""
    # Streamed adj tile in its storage dtype; cast to bf16 for the MXU (VPU
    # convert on a VMEM tile, hidden under the next tile's DMA).
    adj = adj_ref[...].astype(jnp.bfloat16)            # (B, tn, Np)
    xwb = xwb_ref[...]                                  # (B, Np, Dout) bf16, resident

    # Single MXU contraction per tile: h = adj @ (x @ W^T + b), f32 accumulation.
    h = jnp.einsum("btm,bmd->btd", adj, xwb,
                   preferred_element_type=jnp.float32)  # (B, tn, Dout) f32

    if use_bn:
        # BatchNorm1d(n_atom), training mode: per-atom statistics over
        # (batch, out_dim), biased variance, centered form (numerically stable).
        inv_count = 1.0 / (batch * out_dim)
        mean = jnp.sum(h, axis=(0, 2), keepdims=True) * inv_count        # (1,tn,1)
        centered = h - mean
        var = jnp.sum(centered * centered, axis=(0, 2), keepdims=True) * inv_count
        # Fused affine: (h - mean) * scale + beta, rsqrt on the EUP.
        scale = gamma_ref[...] * jax.lax.rsqrt(var + eps)                 # (1,tn,1)
        h = centered * scale + beta_ref[...]

    out_ref[...] = jnp.maximum(h, 0.0)                   # ReLU, f32 store


def _round_up(v, m):
    return ((v + m - 1) // m) * m


def _working_set(B, tn, n_cols, Dout, adj_itemsize, resident_bytes):
    """Per-step VMEM working-set estimate (includes live in-kernel intermediates)."""
    adj_stream = B * tn * n_cols * adj_itemsize * 2   # streamed adj tile, double-buffered
    adj_bf16 = B * tn * n_cols * 2                    # live bf16 copy made in-kernel
    out_stream = B * tn * Dout * 4 * 2                # f32 output tile, double-buffered
    h_live = 2 * B * tn * Dout * 4                    # f32 h + centered intermediates
    small = 4 * tn * 4 * 2                            # gamma/beta tiles
    return adj_stream + adj_bf16 + out_stream + h_live + resident_bytes + small


def _choose_tiling(B, N, Dout, adj_itemsize, resident_bytes, budget):
    """Largest atom tile (multiple of 8) whose working set fits the VMEM budget,
    capped so the grid has >= 2 steps whenever N allows it (v7x: 2 TensorCores)."""
    n8 = _round_up(N, 8)
    cap = max(8, (n8 // 2) // 8 * 8) if n8 >= 16 else n8
    tn = cap
    while tn > 8 and _working_set(B, tn, n8, Dout, adj_itemsize, resident_bytes) > budget:
        tn -= 8
    steps = -(-n8 // tn)                 # ceil
    if n8 >= 16:
        steps = max(2, steps)            # keep >= 2 grid steps for megacore sharding
    tn = _round_up(-(-n8 // steps), 8)   # even out the tiles -> minimal atom padding
    n_pad = tn * steps
    return tn, n_pad, _working_set(B, tn, n_pad, Dout, adj_itemsize, resident_bytes)


def gcn_layer(x, adj, weight, bias, gamma, beta, *, use_bn=True, eps=1e-5,
              tile_n=None, matmul_dtype=jnp.bfloat16):
    """Pallas GCN layer.

    x:      (B, n_atom, in_dim)   float32
    adj:    (B, n_atom, n_atom)   float32 (or bf16 if pre-cast by the caller)
    weight: (out_dim, in_dim)     float32   (torch nn.Linear layout)
    bias:   (out_dim,)            float32
    gamma:  (n_atom,)             float32   (BatchNorm1d weight)
    beta:   (n_atom,)             float32   (BatchNorm1d bias)
    returns (B, n_atom, out_dim)  float32
    """
    B, N, Din = x.shape
    Dout = weight.shape[0]
    assert adj.shape == (B, N, N)

    # Pre-fuse the Linear once on the small node-feature tensor (B*N*Dout); the
    # Linear math itself runs in f32 (matches the PyTorch module), then a single
    # bf16 quantization for the MXU.
    xwb = jnp.einsum("bnd,od->bno", jnp.asarray(x, jnp.float32),
                     jnp.asarray(weight, jnp.float32))
    xwb = (xwb + jnp.asarray(bias, jnp.float32)).astype(matmul_dtype)   # (B, N, Dout)

    # Generation-aware VMEM budget / compiler limit.
    try:
        vmem_cap = int(pltpu.get_tpu_info().vmem_capacity_bytes)
    except Exception:
        vmem_cap = 64 * 1024 * 1024                   # conservative fallback (v7x)
    budget = int(vmem_cap * 0.75)                     # ~96 MiB v5e/v6e, ~48 MiB v7x

    resident_bytes = 2 * B * N * Dout * xwb.dtype.itemsize   # resident xwb (2 buffers)
    adj_itemsize = jnp.dtype(adj.dtype).itemsize

    if tile_n is None:
        tile_n, n_pad, ws = _choose_tiling(B, N, Dout, adj_itemsize,
                                           resident_bytes, budget)
    else:
        assert tile_n % 8 == 0, "tile_n must be a multiple of 8"
        n_pad = _round_up(N, tile_n)
        ws = _working_set(B, tile_n, n_pad, Dout, adj_itemsize, resident_bytes)

    vmem_limit = min(int(0.9 * vmem_cap), max(ws + (16 << 20), 32 << 20))

    # Zero-pad the atom axis if N is not divisible by the tile. Padded atoms have
    # all-zero adj rows/cols; BN is per-atom, so they cannot affect real atoms.
    pad = n_pad - N
    g3 = jnp.asarray(gamma, jnp.float32).reshape(1, N, 1)
    b3 = jnp.asarray(beta, jnp.float32).reshape(1, N, 1)
    adj_p, xwb_p = adj, xwb
    if pad:
        adj_p = jnp.pad(adj, ((0, 0), (0, pad), (0, pad)))
        xwb_p = jnp.pad(xwb, ((0, 0), (0, pad), (0, 0)))
        g3 = jnp.pad(g3, ((0, 0), (0, pad), (0, 0)), constant_values=1.0)
        b3 = jnp.pad(b3, ((0, 0), (0, pad), (0, 0)))

    grid = (n_pad // tile_n,)
    kernel = functools.partial(_gcn_kernel, use_bn=use_bn, eps=eps,
                               batch=B, out_dim=Dout)

    # TODO(synk): for very large N the full-width adj rows and the resident xwb
    # would also need tiling along the source-atom (contraction) axis; not
    # needed at molecular-graph sizes.
    out = pl.pallas_call(
        kernel,
        out_shape=jax.ShapeDtypeStruct((B, n_pad, Dout), jnp.float32),
        grid=grid,
        in_specs=[
            pl.BlockSpec((B, tile_n, n_pad), lambda i: (0, i, 0)),   # adj: streamed
            pl.BlockSpec((B, n_pad, Dout), lambda i: (0, 0, 0)),     # xwb: resident
            pl.BlockSpec((1, tile_n, 1), lambda i: (0, i, 0)),       # gamma tile
            pl.BlockSpec((1, tile_n, 1), lambda i: (0, i, 0)),       # beta tile
        ],
        out_specs=pl.BlockSpec((B, tile_n, Dout), lambda i: (0, i, 0)),
        compiler_params=pltpu.CompilerParams(
            dimension_semantics=("parallel",),        # atom tiles independent
            vmem_limit_bytes=vmem_limit,
        ),
    )(adj_p, xwb_p, g3, b3)

    return out if pad == 0 else out[:, :N, :]


def _reference(x, adj, weight, bias, gamma, beta, use_bn=True, eps=1e-5):
    """Pure-f32 JAX reference mirroring the PyTorch module (training-mode BN)."""
    h = jnp.einsum("bnd,od->bno", x, weight) + bias
    h = jnp.einsum("bnm,bmo->bno", adj, h)
    if use_bn:
        mean = jnp.mean(h, axis=(0, 2), keepdims=True)
        var = jnp.mean((h - mean) ** 2, axis=(0, 2), keepdims=True)
        h = (h - mean) / jnp.sqrt(var + eps)
        h = h * gamma.reshape(1, -1, 1) + beta.reshape(1, -1, 1)
    return jnp.maximum(h, 0.0)


if __name__ == "__main__":
    # Small shapes consistent with the module; the auto-tiler picks tile_n=16
    # -> grid=(2,), so the pipelined / parallel path is actually exercised.
    B, N, Din, Dout = 4, 32, 16, 32
    use_bn = True

    key = jax.random.PRNGKey(0)
    kx, kadj, kw, kb = jax.random.split(key, 4)

    x = jax.random.normal(kx, (B, N, Din), dtype=jnp.float32)
    a = jax.random.uniform(kadj, (B, N, N), dtype=jnp.float32)
    adj = 0.5 * (a + jnp.swapaxes(a, 1, 2)) + jnp.eye(N, dtype=jnp.float32)

    bound = 1.0 / (Din ** 0.5)
    weight = jax.random.uniform(kw, (Dout, Din), minval=-bound, maxval=bound,
                                dtype=jnp.float32)
    bias = jax.random.uniform(kb, (Dout,), minval=-bound, maxval=bound,
                              dtype=jnp.float32)
    gamma = jnp.ones((N,), jnp.float32)
    beta = jnp.zeros((N,), jnp.float32)

    out = gcn_layer(x, adj, weight, bias, gamma, beta, use_bn=use_bn)
    out = jax.block_until_ready(out)

    ref = _reference(x, adj, weight, bias, gamma, beta, use_bn=use_bn)
    assert out.shape == (B, N, Dout)
    # Single bf16 quantization of the MXU operands (f32 accumulation) -> ~1e-2
    # level error vs the pure-f32 reference.
    assert jnp.allclose(out, ref, atol=4e-2, rtol=4e-2), "mismatch vs reference"

    print("KERNEL_OK")
</pallas_src>

<mosaic_0001>
module attributes {stable_mosaic.version = 11 : i64} {
  func.func @_gcn_kernel(%arg0: i32, %arg1: memref<4x16x32xf32, #tpu.memory_space<vmem>>, %arg2: memref<4x32x32xbf16, #tpu.memory_space<vmem>>, %arg3: memref<1x16x1xf32, #tpu.memory_space<vmem>>, %arg4: memref<1x16x1xf32, #tpu.memory_space<vmem>>, %arg5: memref<4x16x32xf32, #tpu.memory_space<vmem>>) attributes {dimension_semantics = [#tpu.dimension_semantics<parallel>], iteration_bounds = array<i64: 2>, scalar_prefetch = 0 : i64, scratch_operands = 0 : i64, tpu.core_type = #tpu.core_type<tc>, window_params = [{transform_indices = @transform_0, window_bounds = array<i64: 4, 16, 32>}, {pipeline_mode = #tpu.pipeline_mode<synchronous>, transform_indices = @transform_1, window_bounds = array<i64: 4, 32, 32>}, {transform_indices = @transform_2, window_bounds = array<i64: 1, 16, 1>}, {transform_indices = @transform_3, window_bounds = array<i64: 1, 16, 1>}, {transform_indices = @transform_4, window_bounds = array<i64: 4, 16, 32>}]} {
    %c0 = arith.constant 0 : index
    %c0_0 = arith.constant 0 : index
    %c0_1 = arith.constant 0 : index
    %0 = vector.load %arg1[%c0, %c0_0, %c0_1] : memref<4x16x32xf32, #tpu.memory_space<vmem>>, vector<4x16x32xf32>
    %1 = arith.truncf %0 : vector<4x16x32xf32> to vector<4x16x32xbf16>
    %c0_2 = arith.constant 0 : index
    %c0_3 = arith.constant 0 : index
    %c0_4 = arith.constant 0 : index
    %2 = vector.load %arg2[%c0_2, %c0_3, %c0_4] : memref<4x32x32xbf16, #tpu.memory_space<vmem>>, vector<4x32x32xbf16>
    "tpu.trace_start"() <{level = 10 : i32, message = "btm,bmd->btd"}> : () -> ()
    %cst = arith.constant dense<0.000000e+00> : vector<4x16x32xf32>
    %3 = tpu.matmul %1, %2, %cst {dimension_numbers = #tpu.dot_dimension_numbers<[2], [1], [1], [2], [0, 0, 0, 1, 1, 2], [0], [0]>} : vector<4x16x32xbf16>, vector<4x32x32xbf16>, vector<4x16x32xf32> -> vector<4x16x32xf32>
    "tpu.trace_stop"() : () -> ()
    %cst_5 = arith.constant dense<0.000000e+00> : vector<16xf32>
    %4 = vector.multi_reduction <add>, %3, %cst_5 [0, 2] : vector<4x16x32xf32> to vector<16xf32>
    %5 = vector.shape_cast %4 : vector<16xf32> to vector<1x16x1xf32>
    %cst_6 = arith.constant 7.812500e-03 : f32
    %6 = vector.broadcast %cst_6 : f32 to vector<1x16x1xf32>
    %7 = arith.mulf %5, %6 : vector<1x16x1xf32>
    %8 = vector.broadcast %7 : vector<1x16x1xf32> to vector<4x16x32xf32>
    %9 = arith.subf %3, %8 : vector<4x16x32xf32>
    %10 = arith.mulf %9, %9 : vector<4x16x32xf32>
    %cst_7 = arith.constant dense<0.000000e+00> : vector<16xf32>
    %11 = vector.multi_reduction <add>, %10, %cst_7 [0, 2] : vector<4x16x32xf32> to vector<16xf32>
    %12 = vector.shape_cast %11 : vector<16xf32> to vector<1x16x1xf32>
    %cst_8 = arith.constant 7.812500e-03 : f32
    %13 = vector.broadcast %cst_8 : f32 to vector<1x16x1xf32>
    %14 = arith.mulf %12, %13 : vector<1x16x1xf32>
    %c0_9 = arith.constant 0 : index
    %c0_10 = arith.constant 0 : index
    %c0_11 = arith.constant 0 : index
    %15 = vector.load %arg3[%c0_9, %c0_10, %c0_11] : memref<1x16x1xf32, #tpu.memory_space<vmem>>, vector<1x16x1xf32>
    %cst_12 = arith.constant 9.99999974E-6 : f32
    %16 = vector.broadcast %cst_12 : f32 to vector<1x16x1xf32>
    %17 = arith.addf %14, %16 : vector<1x16x1xf32>
    %18 = math.rsqrt %17 : vector<1x16x1xf32>
    %19 = arith.mulf %15, %18 : vector<1x16x1xf32>
    %20 = vector.broadcast %19 : vector<1x16x1xf32> to vector<4x16x32xf32>
    %21 = arith.mulf %9, %20 : vector<4x16x32xf32>
    %c0_13 = arith.constant 0 : index
    %c0_14 = arith.constant 0 : index
    %c0_15 = arith.constant 0 : index
    %22 = vector.load %arg4[%c0_13, %c0_14, %c0_15] : memref<1x16x1xf32, #tpu.memory_space<vmem>>, vector<1x16x1xf32>
    %23 = vector.broadcast %22 : vector<1x16x1xf32> to vector<4x16x32xf32>
    %24 = arith.addf %21, %23 : vector<4x16x32xf32>
    %cst_16 = arith.constant 0.000000e+00 : f32
    %25 = vector.broadcast %cst_16 : f32 to vector<4x16x32xf32>
    %26 = arith.maximumf %24, %25 : vector<4x16x32xf32>
    %c0_17 = arith.constant 0 : index
    %c0_18 = arith.constant 0 : index
    %c0_19 = arith.constant 0 : index
    %27 = vector.load %arg5[%c0_17, %c0_18, %c0_19] : memref<4x16x32xf32, #tpu.memory_space<vmem>>, vector<4x16x32xf32>
    tpu.vector_store %arg5[%c0_17, %c0_18, %c0_19], %26 {strides = array<i32>} : memref<4x16x32xf32, #tpu.memory_space<vmem>>, vector<4x16x32xf32>,
    return
  }
  func.func @transform_0(%arg0: i32) -> (i32, i32, i32) {
    %c0_i32 = arith.constant 0 : i32
    %c0_i32_0 = arith.constant 0 : i32
    %c0_i32_1 = arith.constant 0 : i32
    return %c0_i32, %arg0, %c0_i32_0 : i32, i32, i32
  }
  func.func @transform_1(%arg0: i32) -> (i32, i32, i32) {
    %c0_i32 = arith.constant 0 : i32
    %c0_i32_0 = arith.constant 0 : i32
    %c0_i32_1 = arith.constant 0 : i32
    %c0_i32_2 = arith.constant 0 : i32
    return %c0_i32, %c0_i32_0, %c0_i32_1 : i32, i32, i32
  }
  func.func @transform_2(%arg0: i32) -> (i32, i32, i32) {
    %c0_i32 = arith.constant 0 : i32
    %c0_i32_0 = arith.constant 0 : i32
    %c0_i32_1 = arith.constant 0 : i32
    return %c0_i32, %arg0, %c0_i32_0 : i32, i32, i32
  }
  func.func @transform_3(%arg0: i32) -> (i32, i32, i32) {
    %c0_i32 = arith.constant 0 : i32
    %c0_i32_0 = arith.constant 0 : i32
    %c0_i32_1 = arith.constant 0 : i32
    return %c0_i32, %arg0, %c0_i32_0 : i32, i32, i32
  }
  func.func @transform_4(%arg0: i32) -> (i32, i32, i32) {
    %c0_i32 = arith.constant 0 : i32
    %c0_i32_0 = arith.constant 0 : i32
    %c0_i32_1 = arith.constant 0 : i32
    return %c0_i32, %arg0, %c0_i32_0 : i32, i32, i32
  }
}

</mosaic_0001>

<bundles_post_ra>
// kernel: tpu_custom_call.1
= control target key start
LH: loop header
LB: loop body
LE: loop exit
PB: predicated region body
PF: predicated region fallthrough
CT: control target
= control target key end

     0   :  { %9 = vsyncpa [#allocation3], 0  ;;  %s1182_s0 = inlined_call_operand.hbm [shape: f32[4,32,32], index: 0, kind: input, shape index: {}]   ;;  %s1183_s1 = inlined_call_operand.vmem [shape: bf16[4,32,32], index: 1, kind: input, shape index: {}]   ;;  %s1184_s2 = inlined_call_operand.vmem [shape: f32[1,32,1], index: 2, kind: input, shape index: {}]   ;;  %s1185_s3 = inlined_call_operand.vmem [shape: f32[1,32,1], index: 3, kind: input, shape index: {}]   ;;  %s1186_s4 = inlined_call_operand.hbm [shape: f32[4,32,32], index: 4, kind: output, shape index: {}]  }
   0x1   :  { %11 = vsyncpa [#allocation3 + $0x1], 0 }
   0x2   :  { %12 = vsyncpa [#allocation4], 0 }
   0x3   :  { %14 = vsyncpa [#allocation4 + $0x1], 0  ;;  %s951_s15 = smov 0   ;;  %s953_s16 = smov 0  }
   0x4   :  { %s955_s17 = smov 0   ;;  %s957_s18 = smov 0  }
   0x5 LB: > { %s972_s19 = sadd.s32 4294967295, %s910_s18   ;;  %s731_s20 = sadd.s32 4294967294, %s910_s18   ;;  %s910_s18 = sphi %s957_s18, %s1194_s18   ;;  %s906_s17 = sphi %s955_s17, %s1193_s17   ;;  %s902_s16 = sphi %s953_s16, %s1192_s16   ;;  %s898_s15 = sphi %s951_s15, %s1191_s15  }
   0x6   : > { %s976_s21 = sadd.s32 1, %s910_s18   ;;  %s27_s22 = sadd.s32 1, %s906_s17 }
   0x7   : > { %s24_s23 = ssub.s32 %s910_s18, %s976_s21  ;;  %p34_p0 = scmp.ne.s32.totalorder %s906_s17, %s902_s16 }
   0x8   : > { %p25_p1 = scmp.eq.s32.totalorder %s24_s23, 0  ;;  %p35_p2 = scmp.eq.s32.totalorder %s910_s18, 0 }
   0x9   : > { %p40_p3 = scmp.ne.s32.totalorder %s902_s16, %s898_s15  ;;  %p41_p4 = scmp.eq.s32.totalorder %s972_s19, 0 }
   0xa   : > { %s988_s24 = scalar_select %p25_p1, %s906_s17, %s27_s22  }
   0xb   : > { %p990_p5 = por %p35_p2, %p34_p0  ;;  %p994_p6 = por %p41_p4, %p40_p3 }
   0xc   : > { %p137_p7 = scmp.eq.s32.totalorder %s972_s19, 1  ;;  %p143_p8 = scmp.eq.s32.totalorder %s731_s20, 1 }
   0xd   : > { %p733_p11 = scmp.ge.s32.totalorder %s910_s18, 2 }
   0xe   : > { %p999_p9 = por %p137_p7, %p34_p0  ;;  %p1003_p10 = por %p143_p8, %p40_p3 }
   0xf   : > { %162 = sbr.rel (%p733_p11) target bundleno = 34 (0x22), region = 20 }
  0x14   : > { %s166_s29 = sand.u32 1, %s906_s17   ;;  %s787_s30 = sshll.u32 %s910_s18, 4 }
  0x15   : > { %s734_s5 = sshll.u32 %s166_s29, 6  ;;  %s175_s8 = scalar_lea.hbm %s1182_s0, %s787_s30 }
  0x16   : > { %s797_s9 = scalar_select %p990_p5, [#allocation0], [#allocation10] }
  0x17   : > { %s188_s10 = sshll.u32 %s175_s8, 4  ;;  %s170_s11 = scalar_lea.vmem [#allocation2], %s734_s5  ;;  %s189_s10 = int_to_ptr.hbm [resolvable:$true] %s188_s10 }
  0x18   : > { %s190_s12 = sshll.u32 %s170_s11, 4  ;;  %s180_s13 = sld [smem:[%s797_s9]]   ;;  %s191_s12 = int_to_ptr.vmem [resolvable:$true] %s190_s12 }
  0x19   : > { %s912_s14 = smov 512   ;;  %s913_s20 = smov 256  }
  0x1a   : > { %798 = sst [smem:[#allocation7]] (%p990_p5), %s912_s14  ;;  %s914_s22 = smov 2  }
  0x1b   : > { %799 = sst [smem:[#allocation7 + $0x1]] (%p990_p5), %s913_s20  ;;  %s915_s23 = smov 128  }
  0x1c   : > { %800 = sst [smem:[#allocation7 + $0x2]] (%p990_p5), %s914_s22  ;;  %s916_s6 = smov 8  }
  0x1d   : > { %801 = sst [smem:[#allocation7 + $0x3]] (%p990_p5), %s915_s23  ;;  %s167_s7 = scalar_lea.sflag [#allocation3], %s166_s29 }
  0x1e   : > { %s737_s30 = sshll.u32 %s180_s13, 26  ;;  %802 = sst [smem:[#allocation7 + $0x4]] (%p990_p5), %s915_s23 }
  0x1f   : > { %s738_s5 = sadd.s32 134217728, %s737_s30  ;;  %803 = sst [smem:[#allocation7 + $0x5]] (%p990_p5), %s916_s6 }
  0x20   : > { %s917_s8 = smov [#allocation6]  }
  0x21   : > { %804 = dma.general (%p990_p5), %s189_s10, 1024, %s191_s12, %s167_s7, %s917_s8, [#allocation7], %s738_s5, 0  }
  0x22 PF: > { %p739_p12 = scmp.ge.s32.totalorder %s910_s18, 1  ;;  %p229_p13 = scmp.lt.s32.totalorder %s910_s18, 3 }
  0x24   : > { %p230_p0 = pnand %p739_p12, %p229_p13 }
  0x25   : > { %s1034_s9 = sand.u32 (!%p230_p0), 1, %s902_s16  }
  0x26   : > { %233 = sbr.rel (%p230_p0) target bundleno = 580 (0x244), region = 36  ;;  %s740_s11 = sshll.u32 (!%p230_p0), %s1034_s9, 6 }
  0x27   : > { %s236_s13 = scalar_lea.sflag (!%p230_p0), [#allocation3], %s1034_s9  ;;  %s239_s29 = scalar_lea.vmem (!%p230_p0), [#allocation2], %s740_s11 }
  0x2b   : > { %889 = dma.done.wait (%p994_p6), %s236_s13, 1024  }
  0x2c   : > { %891 = vsyncadd (%p994_p6), %s236_s13, 4294966272  ;;  %v789_v0 = vld [vmem:[%s1183_s1 + $0x8] sm:$0xff]  ;;  %v791_v1 = vld [vmem:[%s1183_s1 + $0x18] sm:$0xff]  ;;  %vm339_vm0 = vcmask 261120   ;;  %s274_s6 = scalar_lea.vmem [#allocation5], %s740_s11  ;;  %s596_s11 = scalar_lea.sflag [#allocation4], %s1034_s9 }
  0x2d   : > { %v793_v2 = vld [vmem:[%s1183_s1 + $0x28] sm:$0xff]  ;;  %v795_v3 = vld [vmem:[%s1183_s1 + $0x38] sm:$0xff]  ;;  %v788_v4 = vld [vmem:[%s1183_s1] sm:$0xff]  ;;  %349 = vmatpush.bf16.msra.mxu0 %v789_v0  ;;  %383 = vmatpush.bf16.msra.mxu1 %v791_v1 }
  0x2e   : > { %v790_v5 = vld [vmem:[%s1183_s1 + $0x10] sm:$0xff]  ;;  %v792_v6 = vld [vmem:[%s1183_s1 + $0x20] sm:$0xff]  ;;  %417 = vmatpush.bf16.msra.mxu2 %v793_v2  ;;  %451 = vmatpush.bf16.msra.mxu3 %v795_v3  ;;  %v291_v9 = vld [vmem:[%s239_s29 + $0x8] sm:$0xff] }
  0x2f   : > { %v794_v7 = vld [vmem:[%s1183_s1 + $0x30] sm:$0xff]  ;;  %v290_v8 = vld [vmem:[%s239_s29] sm:$0xff]  ;;  %v293_v12 = vld [vmem:[%s239_s29 + $0x18] sm:$0xff]  ;;  %v299_v13 = vpack.c.bf16 %v291_v9, %v291_v9 }
  0x30   : > { %v298_v10 = vpack.c.bf16 %v290_v8, %v290_v8  ;;  %v292_v11 = vld [vmem:[%s239_s29 + $0x10] sm:$0xff]  ;;  %v301_v15 = vpack.c.bf16 %v293_v12, %v293_v12  ;;  %v294_v16 = vld [vmem:[%s239_s29 + $0x20] sm:$0xff]  ;;  %v295_v17 = vld [vmem:[%s239_s29 + $0x28] sm:$0xff] }
  0x31   : > { %v300_v14 = vpack.c.bf16 %v292_v11, %v292_v11  ;;  %v296_v18 = vld [vmem:[%s239_s29 + $0x30] sm:$0xff]  ;;  %v302_v20 = vpack.c.bf16 %v294_v16, %v294_v16  ;;  %v303_v21 = vpack.c.bf16 %v295_v17, %v295_v17  ;;  %v297_v22 = vld [vmem:[%s239_s29 + $0x38] sm:$0xff]  ;;  %350 = vmatpush.bf16.msra.mxu0 %v788_v4  ;;  %384 = vmatpush.bf16.msra.mxu1 %v790_v5  ;;  %v325_v24 = vunpack.c.l.b16 %v299_v13  ;;  %s742_s29 = sshll.u32 %s972_s19, 1 }
  0x32   : > { %v324_v19 = vunpack.c.l.b16 %v298_v10  ;;  %v304_v23 = vpack.c.bf16 %v296_v18, %v296_v18  ;;  %v360_v26 = vunpack.c.l.b16 %v301_v15  ;;  %v305_v27 = vpack.c.bf16 %v297_v22, %v297_v22  ;;  %418 = vmatpush.bf16.msra.mxu2 %v792_v6  ;;  %452 = vmatpush.bf16.msra.mxu3 %v794_v7  ;;  %p277_p1 = scmp.lt.s32.totalorder %s742_s29, 3 }
  0x33   : > { %v359_v25 = vunpack.c.l.b16 %v300_v14  ;;  %v393_v28 = vunpack.c.l.b16 %v302_v20  ;;  %v394_v29 = vunpack.c.l.b16 %v303_v21 }
  0x34   : > { %v427_v30 = vunpack.c.l.b16 %v304_v23  ;;  %v326_v31 = vpack.c.b16 %v325_v24, %v324_v19  ;;  %v428_v33 = vunpack.c.l.b16 %v305_v27  ;;  %s1196_s29 = smov (!%p277_p1, %s742_s29), 3 }
  0x35   : > { %v361_v32 = vpack.c.b16 %v360_v26, %v359_v25  ;;  %v395_v34 = vpack.c.b16 %v394_v29, %v393_v28  ;;  %s743_s12 = sshll.u32 %s1196_s29, 3  ;;  %v918_v28 = vmov 0  }
  0x36   : > { %754 = vmatmul.msk.bf16.vlgmr.msra.gmra.mxu0 %vm339_vm0, %v326_v31  ;;  %v429_v35 = vpack.c.b16 %v428_v33, %v427_v30  ;;  %s286_s22 = scalar_lea.vmem %s1185_s3, %s743_s12  ;;  %866 = vset.pattern.permute.xlu0 %v918_v28  ;;  %s280_s5 = scalar_lea.vmem %s1184_s2, %s743_s12 }
  0x37   : > { %763 = vmatmul.msk.bf16.vlgmr.msra.gmra.mxu1 %vm339_vm0, %v361_v32  ;;  %772 = vmatmul.msk.bf16.vlgmr.msra.gmra.mxu2 %vm339_vm0, %v395_v34  ;;  %v559_v29 = vld [vmem:[%s286_s22] sm:$0xff]  ;;  %v560_v30 = vld [vmem:[%s286_s22 + $0x8] sm:$0xff] }
  0x38   : > { %781 = vmatmul.msk.bf16.vlgmr.msra.gmra.mxu3 %vm339_vm0, %v429_v35  ;;  %867 = vset.pattern.permute.xlu1 %v918_v28 }
  0x39   : > { %865 = vset.pattern.permute.xlu2 %v918_v28 }
  0xb3   : > { %v352_v36 = vpop.f32.mrf.mxu0 }
  0xb4   : > { %v386_v37 = vpop.f32.mrf.mxu1  ;;  %v459_v38 = vsel %vm339_vm0, %v352_v36, 0.0 }
  0xb5   : > { %v460_v39 = vsel %vm339_vm0, %v386_v37, 0.0 }
  0xb6   : > { %v461_v40 = vadd.f32 %v460_v39, %v459_v38 }
  0xba   : > { %v420_v41 = vpop.f32.mrf.mxu2 }
  0xbb   : > { %v462_v42 = vsel %vm339_vm0, %v420_v41, 0.0  ;;  %v454_v43 = vpop.f32.mrf.mxu3  ;;  %v354_v44 = vpop.f32.mrf.mxu0 }
  0xbc   : > { %v388_v45 = vpop.f32.mrf.mxu1  ;;  %v463_v46 = vadd.f32 %v462_v42, %v461_v40  ;;  %v464_v47 = vsel %vm339_vm0, %v454_v43, 0.0  ;;  %v468_v49 = vsel %vm339_vm0, %v354_v44, 0.0 }
  0xbd   : > { %v469_v50 = vsel %vm339_vm0, %v388_v45, 0.0 }
  0xbe   : > { %v465_v48 = vadd.f32 %v464_v47, %v463_v46  ;;  %v470_v51 = vadd.f32 %v469_v50, %v468_v49 }
  0xc0   : > { %466 = vadd.xlane.f32.xlu0 %v465_v48 }
  0xc2   : > { %v422_v52 = vpop.f32.mrf.mxu2 }
  0xc3   : > { %v471_v53 = vsel %vm339_vm0, %v422_v52, 0.0  ;;  %v456_v54 = vpop.f32.mrf.mxu3 }
  0xc4   : > { %v472_v55 = vadd.f32 %v471_v53, %v470_v51  ;;  %v473_v56 = vsel %vm339_vm0, %v456_v54, 0.0  ;;  %v516_v51 = vld [vmem:[%s280_s5 + $0x8] sm:$0xff] }
  0xc6   : > { %v474_v57 = vadd.f32 %v473_v56, %v472_v55 }
  0xc8   : > { %475 = vadd.xlane.f32.xlu0 %v474_v57 }
  0xdc   : > { %563 = vperm.xlu0 %866, %v559_v29  }
 0x133   : > { %v467_v58 = vpop.xlane.xlu0 %466 }
 0x134   : > { %v477_v59 = vmul.f32 0.0078125, %v467_v58 }
 0x136   : > { %v1080_v60 = vsub.f32 %v352_v36, %v477_v59  ;;  %v1082_v61 = vsub.f32 %v386_v37, %v477_v59  ;;  %v1084_v62 = vsub.f32 %v420_v41, %v477_v59  ;;  %v1086_v63 = vsub.f32 %v454_v43, %v477_v59 }
 0x138   : > { %v487_v0 = vmul.f32 %v1080_v60, %v1080_v60  ;;  %v489_v1 = vmul.f32 %v1082_v61, %v1082_v61  ;;  %v491_v2 = vmul.f32 %v1084_v62, %v1084_v62  ;;  %v493_v3 = vmul.f32 %v1086_v63, %v1086_v63 }
 0x13a   : > { %v495_v4 = vsel %vm339_vm0, %v487_v0, 0.0  ;;  %v496_v5 = vsel %vm339_vm0, %v489_v1, 0.0  ;;  %v498_v9 = vsel %vm339_vm0, %v491_v2, 0.0  ;;  %v500_v11 = vsel %vm339_vm0, %v493_v3, 0.0 }
 0x13b   : > { %v476_v6 = vpop.xlane.xlu0 %475  ;;  %v497_v7 = vadd.f32 %v496_v5, %v495_v4 }
 0x13c   : > { %v478_v8 = vmul.f32 0.0078125, %v476_v6 }
 0x13d   : > { %v499_v10 = vadd.f32 %v498_v9, %v497_v7 }
 0x13e   : > { %v1100_v12 = vsub.f32 %v354_v44, %v478_v8  ;;  %v1102_v13 = vsub.f32 %v388_v45, %v478_v8  ;;  %v1104_v14 = vsub.f32 %v422_v52, %v478_v8  ;;  %v1106_v15 = vsub.f32 %v456_v54, %v478_v8  ;;  %v515_v44 = vld [vmem:[%s280_s5] sm:$0xff] }
 0x13f   : > { %v501_v16 = vadd.f32 %v500_v11, %v499_v10 }
 0x140   : > { %v488_v17 = vmul.f32 %v1100_v12, %v1100_v12  ;;  %v490_v18 = vmul.f32 %v1102_v13, %v1102_v13  ;;  %v492_v19 = vmul.f32 %v1104_v14, %v1104_v14  ;;  %v494_v20 = vmul.f32 %v1106_v15, %v1106_v15 }
 0x141   : > { %502 = vadd.xlane.f32.xlu1 %v501_v16 }
 0x142   : > { %v504_v21 = vsel %vm339_vm0, %v488_v17, 0.0  ;;  %v505_v22 = vsel %vm339_vm0, %v490_v18, 0.0  ;;  %v507_v24 = vsel %vm339_vm0, %v492_v19, 0.0  ;;  %v509_v26 = vsel %vm339_vm0, %v494_v20, 0.0 }
 0x143   : > { %v506_v23 = vadd.f32 %v505_v22, %v504_v21 }
 0x145   : > { %v508_v25 = vadd.f32 %v507_v24, %v506_v23 }
 0x147   : > { %v510_v27 = vadd.f32 %v509_v26, %v508_v25 }
 0x149   : > { %511 = vadd.xlane.f32.xlu1 %v510_v27 }
 0x14e   : > { %v564_v56 = vpop.permute.xlu0 %563 }
 0x162   : > { %568 = vperm.xlu1 %867, %v560_v30  }
 0x1b4   : > { %v503_v31 = vpop.xlane.xlu1 %502 }
 0x1b5   : > { %v513_v32 = vmul.f32 0.0078125, %v503_v31 }
 0x1b7   : > { %v517_v33 = vadd.f32 1e-05, %v513_v32 }
 0x1b9   : > { %868 = vrsqrt.f32 %v517_v33  ;;  %vm525_vm2 = vweird.f32 %v517_v33 }
 0x1bc   : > { %v512_v34 = vpop.xlane.xlu1 %511 }
 0x1bd   : > { %v514_v35 = vmul.f32 0.0078125, %v512_v34 }
 0x1bf   : > { %v869_v36 = vpop.eup %868  ;;  %v518_v37 = vadd.f32 1e-05, %v514_v35 }
 0x1c0   : > { %v520_v38 = vmul.f32 %v869_v36, %v517_v33  ;;  %vm526_vm1 = vweird.f32 %v869_v36 }
 0x1c1   : > { %870 = vrsqrt.f32 %v518_v37  ;;  %vm527_vm3 = vmor %vm525_vm2, %vm526_vm1  ;;  %vm535_vm5 = vweird.f32 %v518_v37 }
 0x1c2   : > { %v521_v39 = vmul.f32 %v869_v36, %v520_v38 }
 0x1c4   : > { %v522_v40 = vmul.f32 0.5, %v521_v39 }
 0x1c6   : > { %v523_v41 = vsub.f32 1.5, %v522_v40 }
 0x1c7   : > { %v871_v42 = vpop.eup %870 }
 0x1c8   : > { %v530_v43 = vmul.f32 %v871_v42, %v518_v37  ;;  %v524_v45 = vmul.f32 %v869_v36, %v523_v41  ;;  %vm536_vm4 = vweird.f32 %v871_v42 }
 0x1c9   : > { %vm537_vm6 = vmor %vm535_vm5, %vm536_vm4 }
 0x1ca   : > { %v531_v46 = vmul.f32 %v871_v42, %v530_v43  ;;  %v528_v47 = vsel %vm527_vm3, %v869_v36, %v524_v45 }
 0x1cb   : > { %v539_v48 = vmul.f32 %v528_v47, %v515_v44 }
 0x1cc   : > { %v532_v49 = vmul.f32 0.5, %v531_v46 }
 0x1cd   : > { %543 = vperm.xlu2 %865, %v539_v48  }
 0x1ce   : > { %v533_v50 = vsub.f32 1.5, %v532_v49 }
 0x1d0   : > { %v534_v52 = vmul.f32 %v871_v42, %v533_v50 }
 0x1d2   : > { %v538_v53 = vsel %vm537_vm6, %v871_v42, %v534_v52 }
 0x1d3   : > { %v540_v54 = vmul.f32 %v538_v53, %v516_v51 }
 0x1d5   : > { %548 = vperm.xlu2 %865, %v540_v54  }
 0x227   : > { %v544_v55 = vpop.permute.xlu2 %543 }
 0x228   : > { %v551_v57 = vmul.f32 %v544_v55, %v1080_v60  ;;  %v553_v58 = vmul.f32 %v544_v55, %v1082_v61  ;;  %v555_v59 = vmul.f32 %v544_v55, %v1084_v62  ;;  %v557_v0 = vmul.f32 %v544_v55, %v1086_v63  ;;  %v569_v61 = vpop.permute.xlu1 %568 }
 0x22a   : > { %v571_v1 = vadd.f32 %v564_v56, %v551_v57  ;;  %v573_v2 = vadd.f32 %v564_v56, %v553_v58  ;;  %v575_v3 = vadd.f32 %v564_v56, %v555_v59  ;;  %v577_v4 = vadd.f32 %v564_v56, %v557_v0 }
 0x22c   : > { %v579_v5 = vmax.f32 %v571_v1, 0.0  ;;  %v581_v6 = vmax.f32 %v573_v2, 0.0  ;;  %v583_v7 = vmax.f32 %v575_v3, 0.0  ;;  %v585_v8 = vmax.f32 %v577_v4, 0.0 }
 0x22e   : > { %587 = vst.msk [vmem:[%s274_s6] sm:$0xff] %vm339_vm0, %v579_v5 }
 0x22f   : > { %589 = vst.msk [vmem:[%s274_s6 + $0x10] sm:$0xff] %vm339_vm0, %v581_v6  ;;  %v549_v60 = vpop.permute.xlu2 %548 }
 0x230   : > { %591 = vst.msk [vmem:[%s274_s6 + $0x20] sm:$0xff] %vm339_vm0, %v583_v7  ;;  %v552_v62 = vmul.f32 %v549_v60, %v1100_v12  ;;  %v554_v63 = vmul.f32 %v549_v60, %v1102_v13  ;;  %v556_v9 = vmul.f32 %v549_v60, %v1104_v14  ;;  %v558_v10 = vmul.f32 %v549_v60, %v1106_v15 }
 0x231   : > { %593 = vst.msk [vmem:[%s274_s6 + $0x30] sm:$0xff] %vm339_vm0, %v585_v8 }
 0x232   : > { %v572_v11 = vadd.f32 %v569_v61, %v552_v62  ;;  %v574_v16 = vadd.f32 %v569_v61, %v554_v63  ;;  %v576_v17 = vadd.f32 %v569_v61, %v556_v9  ;;  %v578_v18 = vadd.f32 %v569_v61, %v558_v10 }
 0x234   : > { %v580_v19 = vmax.f32 %v572_v11, 0.0  ;;  %v582_v20 = vmax.f32 %v574_v16, 0.0  ;;  %v584_v21 = vmax.f32 %v576_v17, 0.0  ;;  %v586_v22 = vmax.f32 %v578_v18, 0.0 }
 0x236   : > { %588 = vst.msk [vmem:[%s274_s6 + $0x8] sm:$0xff] %vm339_vm0, %v580_v19 }
 0x237   : > { %590 = vst.msk [vmem:[%s274_s6 + $0x18] sm:$0xff] %vm339_vm0, %v582_v20 }
 0x238   : > { %592 = vst.msk [vmem:[%s274_s6 + $0x28] sm:$0xff] %vm339_vm0, %v584_v21 }
 0x239   : > { %594 = vst.msk [vmem:[%s274_s6 + $0x38] sm:$0xff] %vm339_vm0, %v586_v22 }
 0x23a   : > { %s796_s26 = sshll.u32 %s972_s19, 4  ;;  %s618_s7 = sshll.u32 %s274_s6, 4  ;;  %s619_s7 = int_to_ptr.vmem [resolvable:$true] %s618_s7 }
 0x23b   : > { %s607_s25 = scalar_lea.hbm %s1186_s4, %s796_s26  ;;  %s919_s29 = smov 256  }
 0x23c   : > { %s620_s10 = sshll.u32 %s607_s25, 4  ;;  %806 = sst [smem:[#allocation9]] (%p999_p9), %s919_s29  ;;  %s621_s10 = int_to_ptr.hbm [resolvable:$true] %s620_s10 }
 0x23d   : > { %s920_s9 = smov 512   ;;  %s921_s12 = smov 2  }
 0x23e   : > { %807 = sst [smem:[#allocation9 + $0x1]] (%p999_p9), %s920_s9  ;;  %s922_s19 = smov 128  }
 0x23f   : > { %808 = sst [smem:[#allocation9 + $0x2]] (%p999_p9), %s921_s12  ;;  %s923_s14 = smov 8  }
 0x240   : > { %809 = sst [smem:[#allocation9 + $0x3]] (%p999_p9), %s922_s19  ;;  %s924_s20 = smov [#allocation8]  }
 0x241   : > { %810 = sst [smem:[#allocation9 + $0x4]] (%p999_p9), %s922_s19  ;;  %s925_s22 = smov 0  }
 0x242   : > { %811 = sst [smem:[#allocation9 + $0x5]] (%p999_p9), %s923_s14 }
 0x243   : > { %812 = dma.general (%p999_p9), %s619_s7, 1024, %s621_s10, %s596_s11, %s924_s20, [#allocation9], %s925_s22, 0  }
 0x244 PF: > { %s648_s23 = sand.u32 1, %s898_s15   ;;  %p815_p2 = pnand %p733_p11, %p1003_p10 }
 0x245   : > { %s649_s30 = scalar_lea.sflag [#allocation4], %s648_s23 }
 0x246   : > { %p816_p3 = pneg %p815_p2 }
 0x248   : > { %893 = dma.done.wait (%p816_p3), %s649_s30, 1024  }
 0x249   : > { %895 = vsyncadd (%p816_p3), %s649_s30, 4294966272  ;;  %p17_p4 = scmp.ge.s32.totalorder %s976_s21, 4   ;;  %s1191_s15 = smov %s902_s16 }
 0x24a   : > { %s1192_s16 = smov %s906_s17  ;;  %s1193_s17 = smov %s988_s24 }
 0x24b   : > { %s1194_s18 = smov %s976_s21  ;;  %19 = sbr.rel (!%p17_p4) target bundleno = 5 (0x5), region = 97 }
 0x250   :  { %655 = vsyncpa [#allocation3], 1 }
 0x251   :  { %657 = vsyncpa [#allocation3 + $0x1], 1 }
 0x252   :  { %658 = vsyncpa [#allocation4], 1 }
 0x253   :  { %660 = vsyncpa [#allocation4 + $0x1], 1 }

</bundles_post_ra>
